<compile_context>
chip_gen: v5e
topology: v5e:2x2
jax: 0.10.0
libtpu: 0.0.40
codegen_flags: <defaults>
</compile_context>

<pallas_src>
import numpy as np
import jax
import jax.numpy as jnp
from jax import lax
from jax.experimental import pallas as pl
from jax.experimental.pallas import tpu as pltpu

NEG_SLOPE = 0.01  # torch.nn.functional.leaky_relu default


def _round_up(x, m):
    return (x + m - 1) // m * m


def _padded_tile_bytes(rows, cols, dtype):
    """VMEM bytes of a (rows, cols) buffer after (sublane, lane) padding."""
    it = np.dtype(dtype).itemsize
    sub = 8 * max(1, 4 // it)          # f32 -> 8 sublanes, bf16 -> 16
    return _round_up(max(rows, 1), sub) * _round_up(max(cols, 1), 128) * it


def _vmem_budget_bytes():
    """Generation-aware scoped-VMEM budget (~75% of physical, <= 100 MiB)."""
    try:
        cap = int(pltpu.get_tpu_info().vmem_capacity_bytes)
    except Exception:                   # conservative fallback (v7x-sized VMEM)
        cap = 64 * 1024 * 1024
    return min((cap * 3) // 4, 100 * 1024 * 1024)


def _footprint_bytes(tb, S, A, H, cdt, stream_buffers):
    """Estimated VMEM footprint for one grid step (padded tiles)."""
    resident = (_padded_tile_bytes(H, S, cdt)            # W1
                + _padded_tile_bytes(H, H, cdt)           # W2_state
                + _padded_tile_bytes(H, A, cdt)           # W2_action
                + _padded_tile_bytes(H, 3, jnp.float32))  # [b1 | b2 | w3]
    streamed = stream_buffers * (_padded_tile_bytes(tb, S, cdt)
                                 + _padded_tile_bytes(tb, A, cdt))
    outputs = 2 * _padded_tile_bytes(1, tb, jnp.float32)
    temps = 3 * _padded_tile_bytes(H, tb, jnp.float32)    # h1 / h2 / matmul temps
    return resident + streamed + outputs + temps + (1 << 20)


def critic_kernel(state_ref, action_ref, w1_ref, w2s_ref, w2a_ref,
                  cols_ref, b3_ref, out_ref):
    """One batch tile.

    Streamed inputs arrive batch-major [tb, F]; contracting the feature axis
    of W[H, F] against the last axis of X[tb, F] yields feature-major [H, tb]
    activations, so the final output is a lane-dense (1, tb) row.
    """
    cols = cols_ref[...]               # (H, 3) f32, resident
    b1 = cols[:, 0:1]
    b2 = cols[:, 1:2]
    w3 = cols[:, 2:3]

    dn = (((1,), (1,)), ((), ()))      # contract last axes: W[H,F] . X[tb,F]^T

    # Layer 1: h1 = leaky_relu(W1 @ state^T + b1)            -> [H, tb]
    h1 = lax.dot_general(w1_ref[...], state_ref[...], dn,
                         preferred_element_type=jnp.float32) + b1
    h1 = jnp.maximum(h1, NEG_SLOPE * h1)

    # Layer 2: concat(h1, action) @ W2^T == W2_state @ h1 + W2_action @ action^T
    h2 = (jnp.dot(w2s_ref[...], h1.astype(w2s_ref.dtype),
                  preferred_element_type=jnp.float32)
          + lax.dot_general(w2a_ref[...], action_ref[...], dn,
                            preferred_element_type=jnp.float32)
          + b2)
    h2 = jnp.maximum(h2, NEG_SLOPE * h2)

    # Output layer (H -> 1): VPU multiply + sublane reduction gives the
    # lane-dense (1, tb) row directly (no 1-column MXU matmul).
    out_ref[...] = jnp.sum(h2 * w3, axis=0, keepdims=True) + b3_ref[0]


def critic_forward(state, action, params, *, compute_dtype=jnp.float32,
                   max_batch_tile=None, stream_buffers=2,
                   use_pipeline_mode=True):
    """state: [B, S], action: [B, A]  ->  value: [B, 1] float32.

    compute_dtype=jnp.bfloat16 is supported (and recommended) on all TPU
    generations, v5e included: only the MXU operands are bf16, accumulation
    and all bias/activation/reduction math stays float32.
    """
    B, S = state.shape
    A = action.shape[-1]
    w1, w2s, w2a, cols, b3 = params
    H = w1.shape[0]

    budget = _vmem_budget_bytes()
    if max_batch_tile is None:
        # v5e / v6e (128 MiB physical VMEM) -> 4096-wide tiles; v7x (64 MiB) -> 2048.
        max_batch_tile = 4096 if budget >= 80 * 1024 * 1024 else 2048

    cdiv = lambda a, b: -(-a // b)
    num_tiles = cdiv(B, max_batch_tile)
    if num_tiles == 1 and B >= 256:
        num_tiles = 2                  # v7x megacore: give both TensorCores a tile

    def tb_for(nt):
        if nt == 1:
            return _round_up(B, 8)     # single full-extent block
        return _round_up(cdiv(B, nt), 128)   # minimal-padding, lane-aligned

    tb = tb_for(num_tiles)
    # More (smaller) tiles if the VMEM footprint would not fit the budget
    # (only matters for very large hidden sizes).
    while (_footprint_bytes(tb, S, A, H, compute_dtype, stream_buffers) > budget
           and tb > 128):
        num_tiles += 1
        tb = tb_for(num_tiles)
    b_pad = tb * num_tiles

    footprint = _footprint_bytes(tb, S, A, H, compute_dtype, stream_buffers)
    vmem_limit = int(min(budget, max(2 * footprint, footprint + (16 << 20))))

    def prep(x):                       # batch-major; fused cast+pad, no transpose
        if x.dtype != compute_dtype:
            x = x.astype(compute_dtype)
        if b_pad != B:
            x = jnp.pad(x, ((0, b_pad - B), (0, 0)))
        return x

    cast = lambda w: w if w.dtype == compute_dtype else w.astype(compute_dtype)

    def spec(shape, index_map, buffers):
        if use_pipeline_mode:
            return pl.BlockSpec(shape, index_map,
                                pipeline_mode=pl.Buffered(buffers))
        return pl.BlockSpec(shape, index_map)

    stream = lambda f: spec((tb, f), lambda i: (i, 0), stream_buffers)
    resident = lambda r, c: spec((r, c), lambda i: (0, 0), 1)

    grid_spec = pltpu.PrefetchScalarGridSpec(
        num_scalar_prefetch=0,
        grid=(num_tiles,),
        in_specs=[
            stream(S),                 # state  (streamed per tile)
            stream(A),                 # action (streamed per tile)
            resident(H, S),            # W1         (single-buffer resident)
            resident(H, H),            # W2_state
            resident(H, A),            # W2_action
            resident(H, 3),            # [b1 | b2 | w3] fused columns (f32)
            pl.BlockSpec((1,), lambda i: (0,),
                         memory_space=pltpu.MemorySpace.SMEM),   # b3 scalar
        ],
        out_specs=pl.BlockSpec((1, tb), lambda i: (0, i)),
    )

    out = pl.pallas_call(
        critic_kernel,
        out_shape=jax.ShapeDtypeStruct((1, b_pad), jnp.float32),
        grid_spec=grid_spec,
        compiler_params=pltpu.CompilerParams(
            dimension_semantics=("parallel",),     # megacore sharding on v7x
            vmem_limit_bytes=vmem_limit,
        ),
    )(prep(state), prep(action), cast(w1), cast(w2s), cast(w2a), cols, b3)

    return out[0, :B][:, None]


def init_params(key, state_dim, action_dim, hidden_size):
    """Deterministic init mirroring torch.nn.Linear's U(-1/sqrt(fan_in), ..).

    Weights stay in torch's [out, in] layout (what the kernel wants); the
    layer-2 weight is split into its state-latent and action columns; the two
    bias columns and the 1-wide output weight are packed into one (H, 3) block.
    """
    ks = jax.random.split(key, 6)

    def linear(kw, kb, fan_in, fan_out):
        bound = 1.0 / (fan_in ** 0.5)
        w = jax.random.uniform(kw, (fan_out, fan_in), jnp.float32, -bound, bound)
        b = jax.random.uniform(kb, (fan_out,), jnp.float32, -bound, bound)
        return w, b

    w1, b1 = linear(ks[0], ks[1], state_dim, hidden_size)
    w2, b2 = linear(ks[2], ks[3], hidden_size + action_dim, hidden_size)
    w3, b3 = linear(ks[4], ks[5], hidden_size, 1)
    cols = jnp.stack([b1, b2, w3[0]], axis=1)    # (H, 3): [b1 | b2 | w3]
    return (w1,                       # (H, S)
            w2[:, :hidden_size],      # (H, H)  state-latent part
            w2[:, hidden_size:],      # (H, A)  action part
            cols,                     # (H, 3)  f32
            b3)                       # (1,)


def critic_ref(state, action, params):
    """Pure-JAX reference matching the PyTorch module exactly (f32)."""
    w1, w2s, w2a, cols, b3 = params
    b1, b2, w3 = cols[:, 0], cols[:, 1], cols[:, 2]
    h1 = jax.nn.leaky_relu(state @ w1.T + b1, NEG_SLOPE)
    h2 = jax.nn.leaky_relu(h1 @ w2s.T + action @ w2a.T + b2, NEG_SLOPE)
    return h2 @ w3[:, None] + b3


def _make_critic(use_pipeline_mode=True):
    def fn(state, action, params, *, compute_dtype=jnp.float32,
           max_batch_tile=None, stream_buffers=2):
        return critic_forward(state, action, params,
                              compute_dtype=compute_dtype,
                              max_batch_tile=max_batch_tile,
                              stream_buffers=stream_buffers,
                              use_pipeline_mode=use_pipeline_mode)
    return jax.jit(fn, static_argnames=("compute_dtype", "max_batch_tile",
                                        "stream_buffers"))


if __name__ == "__main__":
    key = jax.random.PRNGKey(0)
    k_s, k_a, k_p, k_s2, k_a2 = jax.random.split(key, 5)

    batch, state_dim, action_dim, hidden_size = 8, 16, 4, 32
    state = jax.random.normal(k_s, (batch, state_dim), jnp.float32)
    action = jax.random.normal(k_a, (batch, action_dim), jnp.float32)
    params = init_params(k_p, state_dim, action_dim, hidden_size)

    critic = _make_critic(use_pipeline_mode=True)
    try:
        value = jax.block_until_ready(critic(state, action, params))
    except Exception:
        # Fallback for jax builds without BlockSpec.pipeline_mode support on
        # the TPU pallas_call path (residents then default to double-buffering).
        critic = _make_critic(use_pipeline_mode=False)
        value = jax.block_until_ready(critic(state, action, params))

    # Small, single-tile case (grid = 1, full-extent blocks).
    expected = critic_ref(state, action, params)
    assert value.shape == (batch, 1)
    assert jnp.allclose(value, expected, atol=1e-5, rtol=1e-5), (value, expected)

    # Multi-tile case: B=600 -> 2 tiles of 384 rows (768 padded, not 1024);
    # the batch axis is "parallel" so v7x megacore splits tiles across cores.
    big_b = 600
    state2 = jax.random.normal(k_s2, (big_b, state_dim), jnp.float32)
    action2 = jax.random.normal(k_a2, (big_b, action_dim), jnp.float32)
    value2 = jax.block_until_ready(critic(state2, action2, params))
    expected2 = critic_ref(state2, action2, params)
    assert value2.shape == (big_b, 1)
    assert jnp.allclose(value2, expected2, atol=1e-4, rtol=1e-4)

    # bf16 MXU operands (fast path on v5e/v6e/v7x alike); f32 accumulation
    # and f32 bias/activation/reduction math.
    value_bf16 = jax.block_until_ready(
        critic(state2, action2, params, compute_dtype=jnp.bfloat16))
    assert value_bf16.shape == (big_b, 1)
    assert bool(jnp.all(jnp.isfinite(value_bf16)))
    assert jnp.allclose(value_bf16, expected2, atol=1e-1, rtol=1e-1)

    print("KERNEL_OK")
</pallas_src>

<mosaic_0001>
module attributes {stable_mosaic.version = 11 : i64} {
  func.func @critic_kernel(%arg0: i32, %arg1: memref<8x16xf32, #tpu.memory_space<vmem>>, %arg2: memref<8x4xf32, #tpu.memory_space<vmem>>, %arg3: memref<32x16xf32, #tpu.memory_space<vmem>>, %arg4: memref<32x32xf32, #tpu.memory_space<vmem>>, %arg5: memref<32x4xf32, #tpu.memory_space<vmem>>, %arg6: memref<32x3xf32, #tpu.memory_space<vmem>>, %arg7: memref<1xf32, #tpu.memory_space<smem>>, %arg8: memref<1x8xf32, #tpu.memory_space<vmem>>) attributes {dimension_semantics = [#tpu.dimension_semantics<parallel>], iteration_bounds = array<i64: 1>, scalar_prefetch = 0 : i64, scratch_operands = 0 : i64, tpu.core_type = #tpu.core_type<tc>, window_params = [{pipeline_mode = #tpu.pipeline_mode<double_buffered>, transform_indices = @transform_0, window_bounds = array<i64: 8, 16>}, {pipeline_mode = #tpu.pipeline_mode<double_buffered>, transform_indices = @transform_1, window_bounds = array<i64: 8, 4>}, {pipeline_mode = #tpu.pipeline_mode<synchronous>, transform_indices = @transform_2, window_bounds = array<i64: 32, 16>}, {pipeline_mode = #tpu.pipeline_mode<synchronous>, transform_indices = @transform_3, window_bounds = array<i64: 32, 32>}, {pipeline_mode = #tpu.pipeline_mode<synchronous>, transform_indices = @transform_4, window_bounds = array<i64: 32, 4>}, {pipeline_mode = #tpu.pipeline_mode<synchronous>, transform_indices = @transform_5, window_bounds = array<i64: 32, 3>}, {transform_indices = @transform_6, window_bounds = array<i64: 1>}, {transform_indices = @transform_7, window_bounds = array<i64: 1, 8>}]} {
    %c0 = arith.constant 0 : index
    %c0_0 = arith.constant 0 : index
    %0 = vector.load %arg6[%c0, %c0_0] : memref<32x3xf32, #tpu.memory_space<vmem>>, vector<32x3xf32>
    %1 = vector.extract_strided_slice %0 {offsets = [0, 0], sizes = [32, 1], strides = [1, 1]} : vector<32x3xf32> to vector<32x1xf32>
    %2 = vector.extract_strided_slice %0 {offsets = [0, 1], sizes = [32, 1], strides = [1, 1]} : vector<32x3xf32> to vector<32x1xf32>
    %3 = vector.extract_strided_slice %0 {offsets = [0, 2], sizes = [32, 1], strides = [1, 1]} : vector<32x3xf32> to vector<32x1xf32>
    %c0_1 = arith.constant 0 : index
    %c0_2 = arith.constant 0 : index
    %4 = vector.load %arg3[%c0_1, %c0_2] : memref<32x16xf32, #tpu.memory_space<vmem>>, vector<32x16xf32>
    %c0_3 = arith.constant 0 : index
    %c0_4 = arith.constant 0 : index
    %5 = vector.load %arg1[%c0_3, %c0_4] : memref<8x16xf32, #tpu.memory_space<vmem>>, vector<8x16xf32>
    %cst = arith.constant dense<0.000000e+00> : vector<32x8xf32>
    %6 = tpu.matmul %4, %5, %cst {dimension_numbers = #tpu.dot_dimension_numbers<[1], [1], [0], [0], [0, 0, 1, 0], [], []>} : vector<32x16xf32>, vector<8x16xf32>, vector<32x8xf32> -> vector<32x8xf32>
    %7 = vector.broadcast %1 : vector<32x1xf32> to vector<32x8xf32>
    %8 = arith.addf %6, %7 : vector<32x8xf32>
    %cst_5 = arith.constant 0.00999999977 : f32
    %9 = vector.broadcast %cst_5 : f32 to vector<32x8xf32>
    %10 = arith.mulf %9, %8 : vector<32x8xf32>
    %11 = arith.maximumf %8, %10 : vector<32x8xf32>
    %c0_6 = arith.constant 0 : index
    %c0_7 = arith.constant 0 : index
    %12 = vector.load %arg4[%c0_6, %c0_7] : memref<32x32xf32, #tpu.memory_space<vmem>>, vector<32x32xf32>
    %cst_8 = arith.constant dense<0.000000e+00> : vector<32x8xf32>
    %13 = tpu.matmul %12, %11, %cst_8 {dimension_numbers = #tpu.dot_dimension_numbers<[1], [0], [0], [1], [0, 0, 1, 1], [], []>} : vector<32x32xf32>, vector<32x8xf32>, vector<32x8xf32> -> vector<32x8xf32>
    %c0_9 = arith.constant 0 : index
    %c0_10 = arith.constant 0 : index
    %14 = vector.load %arg5[%c0_9, %c0_10] : memref<32x4xf32, #tpu.memory_space<vmem>>, vector<32x4xf32>
    %c0_11 = arith.constant 0 : index
    %c0_12 = arith.constant 0 : index
    %15 = vector.load %arg2[%c0_11, %c0_12] : memref<8x4xf32, #tpu.memory_space<vmem>>, vector<8x4xf32>
    %cst_13 = arith.constant dense<0.000000e+00> : vector<32x8xf32>
    %16 = tpu.matmul %14, %15, %cst_13 {dimension_numbers = #tpu.dot_dimension_numbers<[1], [1], [0], [0], [0, 0, 1, 0], [], []>} : vector<32x4xf32>, vector<8x4xf32>, vector<32x8xf32> -> vector<32x8xf32>
    %17 = arith.addf %13, %16 : vector<32x8xf32>
    %18 = vector.broadcast %2 : vector<32x1xf32> to vector<32x8xf32>
    %19 = arith.addf %17, %18 : vector<32x8xf32>
    %cst_14 = arith.constant 0.00999999977 : f32
    %20 = vector.broadcast %cst_14 : f32 to vector<32x8xf32>
    %21 = arith.mulf %20, %19 : vector<32x8xf32>
    %22 = arith.maximumf %19, %21 : vector<32x8xf32>
    %23 = vector.broadcast %3 : vector<32x1xf32> to vector<32x8xf32>
    %24 = arith.mulf %22, %23 : vector<32x8xf32>
    %cst_15 = arith.constant dense<0.000000e+00> : vector<8xf32>
    %25 = vector.multi_reduction <add>, %24, %cst_15 [0] : vector<32x8xf32> to vector<8xf32>
    %26 = vector.shape_cast %25 : vector<8xf32> to vector<1x8xf32>
    %c0_16 = arith.constant 0 : index
    %27 = memref.load %arg7[%c0_16] : memref<1xf32, #tpu.memory_space<smem>>
    %28 = vector.broadcast %27 : f32 to vector<1x8xf32>
    %29 = arith.addf %26, %28 : vector<1x8xf32>
    %c0_17 = arith.constant 0 : index
    %c0_18 = arith.constant 0 : index
    %30 = vector.load %arg8[%c0_17, %c0_18] : memref<1x8xf32, #tpu.memory_space<vmem>>, vector<1x8xf32>
    tpu.vector_store %arg8[%c0_17, %c0_18], %29 {strides = array<i32>} : memref<1x8xf32, #tpu.memory_space<vmem>>, vector<1x8xf32>,
    return
  }
  func.func @transform_0(%arg0: i32) -> (i32, i32) {
    %c0_i32 = arith.constant 0 : i32
    %c0_i32_0 = arith.constant 0 : i32
    return %arg0, %c0_i32 : i32, i32
  }
  func.func @transform_1(%arg0: i32) -> (i32, i32) {
    %c0_i32 = arith.constant 0 : i32
    %c0_i32_0 = arith.constant 0 : i32
    return %arg0, %c0_i32 : i32, i32
  }
  func.func @transform_2(%arg0: i32) -> (i32, i32) {
    %c0_i32 = arith.constant 0 : i32
    %c0_i32_0 = arith.constant 0 : i32
    %c0_i32_1 = arith.constant 0 : i32
    return %c0_i32, %c0_i32_0 : i32, i32
  }
  func.func @transform_3(%arg0: i32) -> (i32, i32) {
    %c0_i32 = arith.constant 0 : i32
    %c0_i32_0 = arith.constant 0 : i32
    %c0_i32_1 = arith.constant 0 : i32
    return %c0_i32, %c0_i32_0 : i32, i32
  }
  func.func @transform_4(%arg0: i32) -> (i32, i32) {
    %c0_i32 = arith.constant 0 : i32
    %c0_i32_0 = arith.constant 0 : i32
    %c0_i32_1 = arith.constant 0 : i32
    return %c0_i32, %c0_i32_0 : i32, i32
  }
  func.func @transform_5(%arg0: i32) -> (i32, i32) {
    %c0_i32 = arith.constant 0 : i32
    %c0_i32_0 = arith.constant 0 : i32
    %c0_i32_1 = arith.constant 0 : i32
    return %c0_i32, %c0_i32_0 : i32, i32
  }
  func.func @transform_6(%arg0: i32) -> i32 {
    %c0_i32 = arith.constant 0 : i32
    %c0_i32_0 = arith.constant 0 : i32
    return %c0_i32 : i32
  }
  func.func @transform_7(%arg0: i32) -> (i32, i32) {
    %c0_i32 = arith.constant 0 : i32
    %c0_i32_0 = arith.constant 0 : i32
    return %c0_i32, %arg0 : i32, i32
  }
}

module attributes {stable_mosaic.version = 11 : i64} {
  func.func @critic_kernel(%arg0: i32, %arg1: memref<8x16xf32, #tpu.memory_space<vmem>>, %arg2: memref<8x4xf32, #tpu.memory_space<vmem>>, %arg3: memref<32x16xf32, #tpu.memory_space<vmem>>, %arg4: memref<32x32xf32, #tpu.memory_space<vmem>>, %arg5: memref<32x4xf32, #tpu.memory_space<vmem>>, %arg6: memref<32x3xf32, #tpu.memory_space<vmem>>, %arg7: memref<1xf32, #tpu.memory_space<smem>>, %arg8: memref<1x8xf32, #tpu.memory_space<vmem>>) attributes {dimension_semantics = [#tpu.dimension_semantics<parallel>], iteration_bounds = array<i64: 1>, scalar_prefetch = 0 : i64, scratch_operands = 0 : i64, tpu.core_type = #tpu.core_type<tc>, window_params = [{transform_indices = @transform_0, window_bounds = array<i64: 8, 16>}, {transform_indices = @transform_1, window_bounds = array<i64: 8, 4>}, {pipeline_mode = #tpu.pipeline_mode<synchronous>, transform_indices = @transform_2, window_bounds = array<i64: 32, 16>}, {pipeline_mode = #tpu.pipeline_mode<synchronous>, transform_indices = @transform_3, window_bounds = array<i64: 32, 32>}, {pipeline_mode = #tpu.pipeline_mode<synchronous>, transform_indices = @transform_4, window_bounds = array<i64: 32, 4>}, {pipeline_mode = #tpu.pipeline_mode<synchronous>, transform_indices = @transform_5, window_bounds = array<i64: 32, 3>}, {transform_indices = @transform_6, window_bounds = array<i64: 1>}, {transform_indices = @transform_7, window_bounds = array<i64: 1, 8>}]} {
    %c0 = arith.constant 0 : index
    %c0_0 = arith.constant 0 : index
    %0 = vector.load %arg6[%c0, %c0_0] : memref<32x3xf32, #tpu.memory_space<vmem>>, vector<32x3xf32>
    %1 = vector.extract_strided_slice %0 {offsets = [0, 0], sizes = [32, 1], strides = [1, 1]} : vector<32x3xf32> to vector<32x1xf32>
    %2 = vector.extract_strided_slice %0 {offsets = [0, 1], sizes = [32, 1], strides = [1, 1]} : vector<32x3xf32> to vector<32x1xf32>
    %3 = vector.extract_strided_slice %0 {offsets = [0, 2], sizes = [32, 1], strides = [1, 1]} : vector<32x3xf32> to vector<32x1xf32>
    %c0_1 = arith.constant 0 : index
    %c0_2 = arith.constant 0 : index
    %4 = vector.load %arg3[%c0_1, %c0_2] : memref<32x16xf32, #tpu.memory_space<vmem>>, vector<32x16xf32>
    %c0_3 = arith.constant 0 : index
    %c0_4 = arith.constant 0 : index
    %5 = vector.load %arg1[%c0_3, %c0_4] : memref<8x16xf32, #tpu.memory_space<vmem>>, vector<8x16xf32>
    %cst = arith.constant dense<0.000000e+00> : vector<32x8xf32>
    %6 = tpu.matmul %4, %5, %cst {dimension_numbers = #tpu.dot_dimension_numbers<[1], [1], [0], [0], [0, 0, 1, 0], [], []>} : vector<32x16xf32>, vector<8x16xf32>, vector<32x8xf32> -> vector<32x8xf32>
    %7 = vector.broadcast %1 : vector<32x1xf32> to vector<32x8xf32>
    %8 = arith.addf %6, %7 : vector<32x8xf32>
    %cst_5 = arith.constant 0.00999999977 : f32
    %9 = vector.broadcast %cst_5 : f32 to vector<32x8xf32>
    %10 = arith.mulf %9, %8 : vector<32x8xf32>
    %11 = arith.maximumf %8, %10 : vector<32x8xf32>
    %c0_6 = arith.constant 0 : index
    %c0_7 = arith.constant 0 : index
    %12 = vector.load %arg4[%c0_6, %c0_7] : memref<32x32xf32, #tpu.memory_space<vmem>>, vector<32x32xf32>
    %cst_8 = arith.constant dense<0.000000e+00> : vector<32x8xf32>
    %13 = tpu.matmul %12, %11, %cst_8 {dimension_numbers = #tpu.dot_dimension_numbers<[1], [0], [0], [1], [0, 0, 1, 1], [], []>} : vector<32x32xf32>, vector<32x8xf32>, vector<32x8xf32> -> vector<32x8xf32>
    %c0_9 = arith.constant 0 : index
    %c0_10 = arith.constant 0 : index
    %14 = vector.load %arg5[%c0_9, %c0_10] : memref<32x4xf32, #tpu.memory_space<vmem>>, vector<32x4xf32>
    %c0_11 = arith.constant 0 : index
    %c0_12 = arith.constant 0 : index
    %15 = vector.load %arg2[%c0_11, %c0_12] : memref<8x4xf32, #tpu.memory_space<vmem>>, vector<8x4xf32>
    %cst_13 = arith.constant dense<0.000000e+00> : vector<32x8xf32>
    %16 = tpu.matmul %14, %15, %cst_13 {dimension_numbers = #tpu.dot_dimension_numbers<[1], [1], [0], [0], [0, 0, 1, 0], [], []>} : vector<32x4xf32>, vector<8x4xf32>, vector<32x8xf32> -> vector<32x8xf32>
    %17 = arith.addf %13, %16 : vector<32x8xf32>
    %18 = vector.broadcast %2 : vector<32x1xf32> to vector<32x8xf32>
    %19 = arith.addf %17, %18 : vector<32x8xf32>
    %cst_14 = arith.constant 0.00999999977 : f32
    %20 = vector.broadcast %cst_14 : f32 to vector<32x8xf32>
    %21 = arith.mulf %20, %19 : vector<32x8xf32>
    %22 = arith.maximumf %19, %21 : vector<32x8xf32>
    %23 = vector.broadcast %3 : vector<32x1xf32> to vector<32x8xf32>
    %24 = arith.mulf %22, %23 : vector<32x8xf32>
    %cst_15 = arith.constant dense<0.000000e+00> : vector<8xf32>
    %25 = vector.multi_reduction <add>, %24, %cst_15 [0] : vector<32x8xf32> to vector<8xf32>
    %26 = vector.shape_cast %25 : vector<8xf32> to vector<1x8xf32>
    %c0_16 = arith.constant 0 : index
    %27 = memref.load %arg7[%c0_16] : memref<1xf32, #tpu.memory_space<smem>>
    %28 = vector.broadcast %27 : f32 to vector<1x8xf32>
    %29 = arith.addf %26, %28 : vector<1x8xf32>
    %c0_17 = arith.constant 0 : index
    %c0_18 = arith.constant 0 : index
    %30 = vector.load %arg8[%c0_17, %c0_18] : memref<1x8xf32, #tpu.memory_space<vmem>>, vector<1x8xf32>
    tpu.vector_store %arg8[%c0_17, %c0_18], %29 {strides = array<i32>} : memref<1x8xf32, #tpu.memory_space<vmem>>, vector<1x8xf32>,
    return
  }
  func.func @transform_0(%arg0: i32) -> (i32, i32) {
    %c0_i32 = arith.constant 0 : i32
    %c0_i32_0 = arith.constant 0 : i32
    return %arg0, %c0_i32 : i32, i32
  }
  func.func @transform_1(%arg0: i32) -> (i32, i32) {
    %c0_i32 = arith.constant 0 : i32
    %c0_i32_0 = arith.constant 0 : i32
    return %arg0, %c0_i32 : i32, i32
  }
  func.func @transform_2(%arg0: i32) -> (i32, i32) {
    %c0_i32 = arith.constant 0 : i32
    %c0_i32_0 = arith.constant 0 : i32
    %c0_i32_1 = arith.constant 0 : i32
    return %c0_i32, %c0_i32_0 : i32, i32
  }
  func.func @transform_3(%arg0: i32) -> (i32, i32) {
    %c0_i32 = arith.constant 0 : i32
    %c0_i32_0 = arith.constant 0 : i32
    %c0_i32_1 = arith.constant 0 : i32
    return %c0_i32, %c0_i32_0 : i32, i32
  }
  func.func @transform_4(%arg0: i32) -> (i32, i32) {
    %c0_i32 = arith.constant 0 : i32
    %c0_i32_0 = arith.constant 0 : i32
    %c0_i32_1 = arith.constant 0 : i32
    return %c0_i32, %c0_i32_0 : i32, i32
  }
  func.func @transform_5(%arg0: i32) -> (i32, i32) {
    %c0_i32 = arith.constant 0 : i32
    %c0_i32_0 = arith.constant 0 : i32
    %c0_i32_1 = arith.constant 0 : i32
    return %c0_i32, %c0_i32_0 : i32, i32
  }
  func.func @transform_6(%arg0: i32) -> i32 {
    %c0_i32 = arith.constant 0 : i32
    %c0_i32_0 = arith.constant 0 : i32
    return %c0_i32 : i32
  }
  func.func @transform_7(%arg0: i32) -> (i32, i32) {
    %c0_i32 = arith.constant 0 : i32
    %c0_i32_0 = arith.constant 0 : i32
    return %c0_i32, %arg0 : i32, i32
  }
}

</mosaic_0001>

<bundles_post_ra>
// kernel: fn.1
= control target key start
LH: loop header
LB: loop body
LE: loop exit
PB: predicated region body
PF: predicated region fallthrough
CT: control target
= control target key end

     0   :  { %vm57_vm0 = vcmask 130048   ;;  %v345_v3 = vmov 0   ;;  %s469_s0 = inlined_call_operand.vmem [shape: f32[8,16], index: 0, kind: input, shape index: {}]   ;;  %s470_s1 = inlined_call_operand.vmem [shape: f32[8,4], index: 1, kind: input, shape index: {}]   ;;  %s471_s2 = inlined_call_operand.vmem [shape: f32[32,16], index: 2, kind: input, shape index: {}]   ;;  %s472_s3 = inlined_call_operand.vmem [shape: f32[32,32], index: 3, kind: input, shape index: {}]   ;;  %s473_s4 = inlined_call_operand.vmem [shape: f32[32,4], index: 4, kind: input, shape index: {}]   ;;  %s474_s5 = inlined_call_operand.vmem [shape: f32[32,3], index: 5, kind: input, shape index: {}]   ;;  %s475_s6 = inlined_call_operand.<no memory space> [shape: f32[1], index: 6, kind: input, shape index: {}]   ;;  %s476_s7 = inlined_call_operand.hbm [shape: f32[1,8], index: 7, kind: output, shape index: {}]  }
   0x1   :  { %v36_v0 = vld [vmem:[%s469_s0] sm:$0xff]  ;;  %v29_v1 = vld [vmem:[%s474_s5 + $0x8] sm:$0xff]  ;;  %312 = vset.pattern.permute.xlu1 %v345_v3  ;;  %311 = vset.pattern.permute.xlu0 %v345_v3  ;;  %v31_v4 = vld [vmem:[%s474_s5 + $0x18] sm:$0xff] }
   0x2   :  { %289 = vmatpush.xpose.msk.msra.mxu0 %vm57_vm0, %v36_v0  ;;  %v32_v2 = vld [vmem:[%s471_s2] sm:$0xff]  ;;  %44 = vperm.xlu1 %312, %v29_v1  }
   0x3   :  { %54 = vperm.xlu0 %311, %v31_v4  }
   0x4   :  { %13 = vsyncpa [#allocation4], 0  ;;  %v406_v5 = vld [vmem:[%s474_s5] sm:$0xff]  ;;  %v411_v6 = vld [vmem:[%s474_s5 + $0x10] sm:$0xff]  ;;  %vm119_vm1 = vcmask 31744   ;;  %v346_v17 = vmov 1  }
   0x5   :  { %290 = vmatmul.msk.f32.vlgmr.msra.gmra.mxu0 %vm57_vm0, %v32_v2  ;;  %v33_v7 = vld [vmem:[%s471_s2 + $0x8] sm:$0xff]  ;;  %v34_v8 = vld [vmem:[%s471_s2 + $0x10] sm:$0xff]  ;;  %v35_v9 = vld [vmem:[%s471_s2 + $0x18] sm:$0xff]  ;;  %313 = vset.pattern.permute.xlu2 %v346_v17  ;;  %v347_v24 = vmov 2   ;;  %vm164_vm2 = vcmask 261120   ;;  %vm254_vm3 = vcmask 64512  }
   0x6   :  { %v118_v10 = vld [vmem:[%s470_s1] sm:$0xff]  ;;  %v115_v14 = vld [vmem:[%s473_s4 + $0x8] sm:$0xff]  ;;  %v116_v19 = vld [vmem:[%s473_s4 + $0x10] sm:$0xff]  ;;  %207 = vperm.xlu2 %313, %v406_v5   ;;  %s348_s9 = smov [#allocation3]   ;;  %s280_s13 = sshll.u32 %s476_s7, 4  ;;  %vm271_vm4 = vcmask 57344   ;;  %s281_s13 = int_to_ptr.hbm [resolvable:$true] %s280_s13 }
   0x7   :  { %294 = vmatpush.xpose.msk.msra.mxu1 %vm119_vm1, %v118_v10  ;;  %v114_v12 = vld [vmem:[%s473_s4] sm:$0xff]  ;;  %v117_v27 = vld [vmem:[%s473_s4 + $0x18] sm:$0xff]  ;;  %v111_v38 = vld [vmem:[%s472_s3 + $0x8] sm:$0xff]  ;;  %s278_s10 = sshll.u32 %s348_s9, 4  ;;  %s279_s10 = int_to_ptr.vmem [resolvable:$true] %s278_s10 }
   0x8   :  { %v110_v37 = vld [vmem:[%s472_s3] sm:$0xff]  ;;  %v112_v39 = vld [vmem:[%s472_s3 + $0x10] sm:$0xff]  ;;  %v113_v40 = vld [vmem:[%s472_s3 + $0x18] sm:$0xff] }
   0xa   :  { %39 = vperm.xlu1 %312, %v406_v5   ;;  %295 = vmatmul.msk.f32.vlgmr.msra.gmra.mxu1 %vm119_vm1, %v114_v12 }
   0xb   :  { %49 = vperm.xlu0 %311, %v411_v6  }
   0xd   :  { %291 = vmatmul.msk.f32.gmra.mxu0 %vm57_vm0, %v33_v7 }
   0xe   :  { %211 = vperm.xlu2 %313, %v29_v1  }
  0x12   :  { %296 = vmatmul.msk.f32.gmra.mxu1 %vm119_vm1, %v115_v14  ;;  %315 = vset.pattern.permute.xlu1 %v346_v17 }
  0x13   :  { %314 = vset.pattern.permute.xlu0 %v346_v17  ;;  %219 = vperm.xlu1 %315, %v31_v4  }
  0x14   :  { %215 = vperm.xlu0 %314, %v411_v6  }
  0x15   :  { %292 = vmatmul.msk.f32.gmra.mxu0 %vm57_vm0, %v34_v8 }
  0x16   :  { %316 = vset.pattern.permute.xlu2 %v347_v24 }
  0x17   :  { %235 = vperm.xlu2 %316, %v406_v5  }
  0x1a   :  { %297 = vmatmul.msk.f32.gmra.mxu1 %vm119_vm1, %v116_v19 }
  0x1b   :  { %317 = vset.pattern.permute.xlu1 %v347_v24 }
  0x1c   :  { %318 = vset.pattern.permute.xlu0 %v347_v24  ;;  %239 = vperm.xlu1 %317, %v29_v1  }
  0x1d   :  { %293 = vmatmul.msk.f32.gmra.mxu0 %vm57_vm0, %v35_v9  ;;  %247 = vperm.xlu0 %318, %v31_v4  }
  0x1f   :  { %243 = vperm.xlu2 %316, %v411_v6  }
  0x22   :  { %298 = vmatmul.msk.f32.gmra.mxu1 %vm119_vm1, %v117_v27 }
  0x60   :  { %v208_v42 = vpop.permute.xlu2 %207 }
  0x68   :  { %v212_v44 = vpop.permute.xlu2 %211 }
  0x71   :  { %v236_v53 = vpop.permute.xlu2 %235 }
  0x74   :  { %v45_v16 = vpop.permute.xlu1 %44 }
  0x75   :  { %v55_v15 = vpop.permute.xlu0 %54 }
  0x79   :  { %v244_v6 = vpop.permute.xlu2 %243 }
  0x7c   :  { %v40_v22 = vpop.permute.xlu1 %39 }
  0x7d   :  { %v50_v20 = vpop.permute.xlu0 %49 }
  0x82   :  { %v90_v11 = vpop.f32.mrf.mxu0 }
  0x83   :  { %v91_v28 = vadd.f32 %v90_v11, %v40_v22 }
  0x85   :  { %v102_v33 = vmul.f32 0.01, %v91_v28  ;;  %v220_v49 = vpop.permute.xlu1 %219 }
  0x86   :  { %v216_v55 = vpop.permute.xlu0 %215 }
  0x87   :  { %v106_v36 = vmax.f32 %v91_v28, %v102_v33  ;;  %v152_v41 = vpop.f32.mrf.mxu1 }
  0x8a   :  { %v93_v13 = vpop.f32.mrf.mxu0 }
  0x8b   :  { %v94_v25 = vadd.f32 %v93_v13, %v45_v16 }
  0x8d   :  { %v103_v31 = vmul.f32 0.01, %v94_v25 }
  0x8e   :  { %v240_v63 = vpop.permute.xlu1 %239 }
  0x8f   :  { %v107_v35 = vmax.f32 %v94_v25, %v103_v31  ;;  %v155_v43 = vpop.f32.mrf.mxu1  ;;  %v248_v12 = vpop.permute.xlu0 %247  ;;  %v269_v25 = vstv %s475_s6 }
  0x92   :  { %v96_v18 = vpop.f32.mrf.mxu0 }
  0x93   :  { %v97_v21 = vadd.f32 %v96_v18, %v50_v20 }
  0x95   :  { %v104_v29 = vmul.f32 0.01, %v97_v21 }
  0x97   :  { %v108_v34 = vmax.f32 %v97_v21, %v104_v29  ;;  %v158_v50 = vpop.f32.mrf.mxu1 }
  0x9a   :  { %v99_v23 = vpop.f32.mrf.mxu0 }
  0x9b   :  { %v100_v26 = vadd.f32 %v99_v23, %v55_v15 }
  0x9d   :  { %v105_v30 = vmul.f32 0.01, %v100_v26 }
  0x9f   :  { %v109_v32 = vmax.f32 %v100_v26, %v105_v30  ;;  %v161_v0 = vpop.f32.mrf.mxu1 }
  0xa1   :  { %189 = vmatpush.msra.mxu2 %v109_v32  ;;  %303 = vmatpush.msra.mxu3 %v109_v32 }
  0xa3   :  { %190 = vmatpush.msra.mxu2 %v108_v34  ;;  %304 = vmatpush.msra.mxu3 %v108_v34 }
  0xa5   :  { %191 = vmatpush.msra.mxu2 %v107_v35  ;;  %305 = vmatpush.msra.mxu3 %v107_v35 }
  0xa7   :  { %192 = vmatpush.msra.mxu2 %v106_v36  ;;  %306 = vmatpush.msra.mxu3 %v106_v36 }
  0xa8   :  { %299 = vmatmul.msk.f32.vlgmr.msra.gmra.mxu2 %vm164_vm2, %v110_v37  ;;  %300 = vmatmul.msk.f32.vlgmr.msra.gmra.mxu3 %vm164_vm2, %v111_v38 }
  0xb0   :  { %301 = vmatmul.msk.f32.gmra.mxu3 %vm164_vm2, %v112_v39 }
  0xb8   :  { %302 = vmatmul.msk.f32.gmra.mxu3 %vm164_vm2, %v113_v40 }
 0x12b   :  { %v194_v45 = vpop.f32.mrf.mxu2  ;;  %v197_v46 = vpop.f32.mrf.mxu3 }
 0x12c   :  { %v195_v47 = vadd.f32 %v194_v45, %v152_v41  ;;  %v198_v48 = vadd.f32 %v197_v46, %v155_v43 }
 0x12e   :  { %v222_v51 = vadd.f32 %v208_v42, %v195_v47  ;;  %v223_v52 = vadd.f32 %v212_v44, %v198_v48 }
 0x130   :  { %v226_v56 = vmul.f32 0.01, %v222_v51  ;;  %v227_v58 = vmul.f32 0.01, %v223_v52 }
 0x132   :  { %v230_v60 = vmax.f32 %v222_v51, %v226_v56  ;;  %v231_v61 = vmax.f32 %v223_v52, %v227_v58 }
 0x133   :  { %v200_v54 = vpop.f32.mrf.mxu3 }
 0x134   :  { %v201_v57 = vadd.f32 %v200_v54, %v158_v50  ;;  %v250_v3 = vmul.f32 %v236_v53, %v230_v60  ;;  %v251_v4 = vmul.f32 %v240_v63, %v231_v61 }
 0x136   :  { %v224_v59 = vadd.f32 %v216_v55, %v201_v57  ;;  %v255_v9 = vsel %vm254_vm3, %v250_v3, 0.0  ;;  %v256_v10 = vsel %vm254_vm3, %v251_v4, 0.0 }
 0x137   :  { %v257_v15 = vadd.f32 %v256_v10, %v255_v9 }
 0x138   :  { %v228_v62 = vmul.f32 0.01, %v224_v59 }
 0x13a   :  { %v232_v1 = vmax.f32 %v224_v59, %v228_v62 }
 0x13b   :  { %v203_v2 = vpop.f32.mrf.mxu3 }
 0x13c   :  { %v204_v5 = vadd.f32 %v203_v2, %v161_v0  ;;  %v252_v7 = vmul.f32 %v244_v6, %v232_v1 }
 0x13e   :  { %v225_v8 = vadd.f32 %v220_v49, %v204_v5  ;;  %v258_v13 = vsel %vm254_vm3, %v252_v7, 0.0 }
 0x13f   :  { %v259_v17 = vadd.f32 %v258_v13, %v257_v15 }
 0x140   :  { %v229_v11 = vmul.f32 0.01, %v225_v8 }
 0x142   :  { %v233_v14 = vmax.f32 %v225_v8, %v229_v11 }
 0x144   :  { %v253_v16 = vmul.f32 %v248_v12, %v233_v14 }
 0x146   :  { %v260_v18 = vsel %vm254_vm3, %v253_v16, 0.0 }
 0x147   :  { %v261_v19 = vadd.f32 %v260_v18, %v259_v17 }
 0x149   :  { %v262_v20 = vrot.slane %v261_v19, 4 }
 0x14b   :  { %v263_v21 = vadd.f32 %v262_v20, %v261_v19 }
 0x14d   :  { %v264_v22 = vrot.slane %v263_v21, 2 }
 0x14f   :  { %v265_v23 = vadd.f32 %v264_v22, %v263_v21 }
 0x151   :  { %v266_v24 = vrot.slane %v265_v23, 1 }
 0x153   :  { %v267_v26 = vadd.f32 %v266_v24, %v265_v23 }
 0x155   :  { %v270_v27 = vadd.f32 %v269_v25, %v267_v26 }
 0x157   :  { %272 = vst.msk [vmem:[#allocation3] sm:$0x1] %vm271_vm4, %v270_v27 }
 0x158   :  { %283 = dma.vmem_to_hbm [thread:$0]  %s279_s10, 16, %s281_s13, [#allocation4]  }
 0x159   :  { %343 = dma.done.wait [#allocation4], 16  }
 0x15a   :  { %344 = vsyncadd [#allocation4], 4294967280 }
 0x15b   :  { %288 = vsyncpa [#allocation4], 1 }

// kernel: fn.1
= control target key start
LH: loop header
LB: loop body
LE: loop exit
PB: predicated region body
PF: predicated region fallthrough
CT: control target
= control target key end

     0   :  { %vm57_vm0 = vcmask 130048   ;;  %v345_v3 = vmov 0   ;;  %s469_s0 = inlined_call_operand.vmem [shape: f32[8,16], index: 0, kind: input, shape index: {}]   ;;  %s470_s1 = inlined_call_operand.vmem [shape: f32[8,4], index: 1, kind: input, shape index: {}]   ;;  %s471_s2 = inlined_call_operand.vmem [shape: f32[32,16], index: 2, kind: input, shape index: {}]   ;;  %s472_s3 = inlined_call_operand.vmem [shape: f32[32,32], index: 3, kind: input, shape index: {}]   ;;  %s473_s4 = inlined_call_operand.vmem [shape: f32[32,4], index: 4, kind: input, shape index: {}]   ;;  %s474_s5 = inlined_call_operand.vmem [shape: f32[32,3], index: 5, kind: input, shape index: {}]   ;;  %s475_s6 = inlined_call_operand.<no memory space> [shape: f32[1], index: 6, kind: input, shape index: {}]   ;;  %s476_s7 = inlined_call_operand.hbm [shape: f32[1,8], index: 7, kind: output, shape index: {}]  }
   0x1   :  { %v36_v0 = vld [vmem:[%s469_s0] sm:$0xff]  ;;  %v29_v1 = vld [vmem:[%s474_s5 + $0x8] sm:$0xff]  ;;  %312 = vset.pattern.permute.xlu1 %v345_v3  ;;  %311 = vset.pattern.permute.xlu0 %v345_v3  ;;  %v31_v4 = vld [vmem:[%s474_s5 + $0x18] sm:$0xff] }
   0x2   :  { %289 = vmatpush.xpose.msk.msra.mxu0 %vm57_vm0, %v36_v0  ;;  %v32_v2 = vld [vmem:[%s471_s2] sm:$0xff]  ;;  %44 = vperm.xlu1 %312, %v29_v1  }
   0x3   :  { %54 = vperm.xlu0 %311, %v31_v4  }
   0x4   :  { %13 = vsyncpa [#allocation4], 0  ;;  %v406_v5 = vld [vmem:[%s474_s5] sm:$0xff]  ;;  %v411_v6 = vld [vmem:[%s474_s5 + $0x10] sm:$0xff]  ;;  %vm119_vm1 = vcmask 31744   ;;  %v346_v17 = vmov 1  }
   0x5   :  { %290 = vmatmul.msk.f32.vlgmr.msra.gmra.mxu0 %vm57_vm0, %v32_v2  ;;  %v33_v7 = vld [vmem:[%s471_s2 + $0x8] sm:$0xff]  ;;  %v34_v8 = vld [vmem:[%s471_s2 + $0x10] sm:$0xff]  ;;  %v35_v9 = vld [vmem:[%s471_s2 + $0x18] sm:$0xff]  ;;  %313 = vset.pattern.permute.xlu2 %v346_v17  ;;  %v347_v24 = vmov 2   ;;  %vm164_vm2 = vcmask 261120   ;;  %vm254_vm3 = vcmask 64512  }
   0x6   :  { %v118_v10 = vld [vmem:[%s470_s1] sm:$0xff]  ;;  %v115_v14 = vld [vmem:[%s473_s4 + $0x8] sm:$0xff]  ;;  %v116_v19 = vld [vmem:[%s473_s4 + $0x10] sm:$0xff]  ;;  %207 = vperm.xlu2 %313, %v406_v5   ;;  %s348_s9 = smov [#allocation3]   ;;  %s280_s13 = sshll.u32 %s476_s7, 4  ;;  %vm271_vm4 = vcmask 57344   ;;  %s281_s13 = int_to_ptr.hbm [resolvable:$true] %s280_s13 }
   0x7   :  { %294 = vmatpush.xpose.msk.msra.mxu1 %vm119_vm1, %v118_v10  ;;  %v114_v12 = vld [vmem:[%s473_s4] sm:$0xff]  ;;  %v117_v27 = vld [vmem:[%s473_s4 + $0x18] sm:$0xff]  ;;  %v111_v38 = vld [vmem:[%s472_s3 + $0x8] sm:$0xff]  ;;  %s278_s10 = sshll.u32 %s348_s9, 4  ;;  %s279_s10 = int_to_ptr.vmem [resolvable:$true] %s278_s10 }
   0x8   :  { %v110_v37 = vld [vmem:[%s472_s3] sm:$0xff]  ;;  %v112_v39 = vld [vmem:[%s472_s3 + $0x10] sm:$0xff]  ;;  %v113_v40 = vld [vmem:[%s472_s3 + $0x18] sm:$0xff] }
   0xa   :  { %39 = vperm.xlu1 %312, %v406_v5   ;;  %295 = vmatmul.msk.f32.vlgmr.msra.gmra.mxu1 %vm119_vm1, %v114_v12 }
   0xb   :  { %49 = vperm.xlu0 %311, %v411_v6  }
   0xd   :  { %291 = vmatmul.msk.f32.gmra.mxu0 %vm57_vm0, %v33_v7 }
   0xe   :  { %211 = vperm.xlu2 %313, %v29_v1  }
  0x12   :  { %296 = vmatmul.msk.f32.gmra.mxu1 %vm119_vm1, %v115_v14  ;;  %315 = vset.pattern.permute.xlu1 %v346_v17 }
  0x13   :  { %314 = vset.pattern.permute.xlu0 %v346_v17  ;;  %219 = vperm.xlu1 %315, %v31_v4  }
  0x14   :  { %215 = vperm.xlu0 %314, %v411_v6  }
  0x15   :  { %292 = vmatmul.msk.f32.gmra.mxu0 %vm57_vm0, %v34_v8 }
  0x16   :  { %316 = vset.pattern.permute.xlu2 %v347_v24 }
  0x17   :  { %235 = vperm.xlu2 %316, %v406_v5  }
  0x1a   :  { %297 = vmatmul.msk.f32.gmra.mxu1 %vm119_vm1, %v116_v19 }
  0x1b   :  { %317 = vset.pattern.permute.xlu1 %v347_v24 }
  0x1c   :  { %318 = vset.pattern.permute.xlu0 %v347_v24  ;;  %239 = vperm.xlu1 %317, %v29_v1  }
  0x1d   :  { %293 = vmatmul.msk.f32.gmra.mxu0 %vm57_vm0, %v35_v9  ;;  %247 = vperm.xlu0 %318, %v31_v4  }
  0x1f   :  { %243 = vperm.xlu2 %316, %v411_v6  }
  0x22   :  { %298 = vmatmul.msk.f32.gmra.mxu1 %vm119_vm1, %v117_v27 }
  0x60   :  { %v208_v42 = vpop.permute.xlu2 %207 }
  0x68   :  { %v212_v44 = vpop.permute.xlu2 %211 }
  0x71   :  { %v236_v53 = vpop.permute.xlu2 %235 }
  0x74   :  { %v45_v16 = vpop.permute.xlu1 %44 }
  0x75   :  { %v55_v15 = vpop.permute.xlu0 %54 }
  0x79   :  { %v244_v6 = vpop.permute.xlu2 %243 }
  0x7c   :  { %v40_v22 = vpop.permute.xlu1 %39 }
  0x7d   :  { %v50_v20 = vpop.permute.xlu0 %49 }
  0x82   :  { %v90_v11 = vpop.f32.mrf.mxu0 }
  0x83   :  { %v91_v28 = vadd.f32 %v90_v11, %v40_v22 }
  0x85   :  { %v102_v33 = vmul.f32 0.01, %v91_v28  ;;  %v220_v49 = vpop.permute.xlu1 %219 }
  0x86   :  { %v216_v55 = vpop.permute.xlu0 %215 }
  0x87   :  { %v106_v36 = vmax.f32 %v91_v28, %v102_v33  ;;  %v152_v41 = vpop.f32.mrf.mxu1 }
  0x8a   :  { %v93_v13 = vpop.f32.mrf.mxu0 }
  0x8b   :  { %v94_v25 = vadd.f32 %v93_v13, %v45_v16 }
  0x8d   :  { %v103_v31 = vmul.f32 0.01, %v94_v25 }
  0x8e   :  { %v240_v63 = vpop.permute.xlu1 %239 }
  0x8f   :  { %v107_v35 = vmax.f32 %v94_v25, %v103_v31  ;;  %v155_v43 = vpop.f32.mrf.mxu1  ;;  %v248_v12 = vpop.permute.xlu0 %247  ;;  %v269_v25 = vstv %s475_s6 }
  0x92   :  { %v96_v18 = vpop.f32.mrf.mxu0 }
  0x93   :  { %v97_v21 = vadd.f32 %v96_v18, %v50_v20 }
  0x95   :  { %v104_v29 = vmul.f32 0.01, %v97_v21 }
  0x97   :  { %v108_v34 = vmax.f32 %v97_v21, %v104_v29  ;;  %v158_v50 = vpop.f32.mrf.mxu1 }
  0x9a   :  { %v99_v23 = vpop.f32.mrf.mxu0 }
  0x9b   :  { %v100_v26 = vadd.f32 %v99_v23, %v55_v15 }
  0x9d   :  { %v105_v30 = vmul.f32 0.01, %v100_v26 }
  0x9f   :  { %v109_v32 = vmax.f32 %v100_v26, %v105_v30  ;;  %v161_v0 = vpop.f32.mrf.mxu1 }
  0xa1   :  { %189 = vmatpush.msra.mxu2 %v109_v32  ;;  %303 = vmatpush.msra.mxu3 %v109_v32 }
  0xa3   :  { %190 = vmatpush.msra.mxu2 %v108_v34  ;;  %304 = vmatpush.msra.mxu3 %v108_v34 }
  0xa5   :  { %191 = vmatpush.msra.mxu2 %v107_v35  ;;  %305 = vmatpush.msra.mxu3 %v107_v35 }
  0xa7   :  { %192 = vmatpush.msra.mxu2 %v106_v36  ;;  %306 = vmatpush.msra.mxu3 %v106_v36 }
  0xa8   :  { %299 = vmatmul.msk.f32.vlgmr.msra.gmra.mxu2 %vm164_vm2, %v110_v37  ;;  %300 = vmatmul.msk.f32.vlgmr.msra.gmra.mxu3 %vm164_vm2, %v111_v38 }
  0xb0   :  { %301 = vmatmul.msk.f32.gmra.mxu3 %vm164_vm2, %v112_v39 }
  0xb8   :  { %302 = vmatmul.msk.f32.gmra.mxu3 %vm164_vm2, %v113_v40 }
 0x12b   :  { %v194_v45 = vpop.f32.mrf.mxu2  ;;  %v197_v46 = vpop.f32.mrf.mxu3 }
 0x12c   :  { %v195_v47 = vadd.f32 %v194_v45, %v152_v41  ;;  %v198_v48 = vadd.f32 %v197_v46, %v155_v43 }
 0x12e   :  { %v222_v51 = vadd.f32 %v208_v42, %v195_v47  ;;  %v223_v52 = vadd.f32 %v212_v44, %v198_v48 }
 0x130   :  { %v226_v56 = vmul.f32 0.01, %v222_v51  ;;  %v227_v58 = vmul.f32 0.01, %v223_v52 }
 0x132   :  { %v230_v60 = vmax.f32 %v222_v51, %v226_v56  ;;  %v231_v61 = vmax.f32 %v223_v52, %v227_v58 }
 0x133   :  { %v200_v54 = vpop.f32.mrf.mxu3 }
 0x134   :  { %v201_v57 = vadd.f32 %v200_v54, %v158_v50  ;;  %v250_v3 = vmul.f32 %v236_v53, %v230_v60  ;;  %v251_v4 = vmul.f32 %v240_v63, %v231_v61 }
 0x136   :  { %v224_v59 = vadd.f32 %v216_v55, %v201_v57  ;;  %v255_v9 = vsel %vm254_vm3, %v250_v3, 0.0  ;;  %v256_v10 = vsel %vm254_vm3, %v251_v4, 0.0 }
 0x137   :  { %v257_v15 = vadd.f32 %v256_v10, %v255_v9 }
 0x138   :  { %v228_v62 = vmul.f32 0.01, %v224_v59 }
 0x13a   :  { %v232_v1 = vmax.f32 %v224_v59, %v228_v62 }
 0x13b   :  { %v203_v2 = vpop.f32.mrf.mxu3 }
 0x13c   :  { %v204_v5 = vadd.f32 %v203_v2, %v161_v0  ;;  %v252_v7 = vmul.f32 %v244_v6, %v232_v1 }
 0x13e   :  { %v225_v8 = vadd.f32 %v220_v49, %v204_v5  ;;  %v258_v13 = vsel %vm254_vm3, %v252_v7, 0.0 }
 0x13f   :  { %v259_v17 = vadd.f32 %v258_v13, %v257_v15 }
 0x140   :  { %v229_v11 = vmul.f32 0.01, %v225_v8 }
 0x142   :  { %v233_v14 = vmax.f32 %v225_v8, %v229_v11 }
 0x144   :  { %v253_v16 = vmul.f32 %v248_v12, %v233_v14 }
 0x146   :  { %v260_v18 = vsel %vm254_vm3, %v253_v16, 0.0 }
 0x147   :  { %v261_v19 = vadd.f32 %v260_v18, %v259_v17 }
 0x149   :  { %v262_v20 = vrot.slane %v261_v19, 4 }
 0x14b   :  { %v263_v21 = vadd.f32 %v262_v20, %v261_v19 }
 0x14d   :  { %v264_v22 = vrot.slane %v263_v21, 2 }
 0x14f   :  { %v265_v23 = vadd.f32 %v264_v22, %v263_v21 }
 0x151   :  { %v266_v24 = vrot.slane %v265_v23, 1 }
 0x153   :  { %v267_v26 = vadd.f32 %v266_v24, %v265_v23 }
 0x155   :  { %v270_v27 = vadd.f32 %v269_v25, %v267_v26 }
 0x157   :  { %272 = vst.msk [vmem:[#allocation3] sm:$0x1] %vm271_vm4, %v270_v27 }
 0x158   :  { %283 = dma.vmem_to_hbm [thread:$0]  %s279_s10, 16, %s281_s13, [#allocation4]  }
 0x159   :  { %343 = dma.done.wait [#allocation4], 16  }
 0x15a   :  { %344 = vsyncadd [#allocation4], 4294967280 }
 0x15b   :  { %288 = vsyncpa [#allocation4], 1 }

</bundles_post_ra>
